<compile_context>
chip_gen: v7x
topology: tpu7x:2x2x1
jax: 0.10.0
libtpu: 0.0.40
codegen_flags: <defaults>
</compile_context>

<pallas_src>
import jax
import jax.numpy as jnp
import numpy as np
from jax.experimental import pallas as pl
from jax.experimental.pallas import tpu as pltpu


def cross_attention_kernel(x1_ref, wq_ref, bq_ref, k_ref, vo_ref, bo_ref,
                           out_ref):
    # x1: bf16 [bq, in_dim1]; wq: bf16 [in_dim1, k_dim] pre-scaled by 1/sqrt(8).
    q = jnp.dot(x1_ref[...], wq_ref[...],
                preferred_element_type=jnp.float32) + bq_ref[...]      # [bq, k_dim] f32

    # logits[b, n] = sum_j q[b, j] * k[n, j]; dot_general keeps the contraction
    # inside the matmul lowering (no k.T relayout copy).
    logits = jax.lax.dot_general(
        q.astype(jnp.bfloat16), k_ref[...],
        dimension_numbers=(((1,), (1,)), ((), ())),
        preferred_element_type=jnp.float32)                            # [bq, N2]

    # Softmax in f32 (v5e has no bf16 VPU/EUP); reciprocal on the EUP approx slot.
    m = jnp.max(logits, axis=-1, keepdims=True)
    e = jnp.exp(logits - m)
    denom = jnp.sum(e, axis=-1, keepdims=True)
    attn = (e * pl.reciprocal(denom, approx=True)).astype(jnp.bfloat16)

    # Reassociated epilogue: vo = (V @ Wo) was precomputed by the wrapper, so
    # attn @ vo == (attn @ V) @ Wo with far fewer block_q-scaled MACs.
    out = jnp.dot(attn, vo_ref[...],
                  preferred_element_type=jnp.float32) + bo_ref[...]    # [bq, in_dim1]
    out_ref[...] = out.astype(out_ref.dtype)


def _grid_plan(B):
    """Return (block_q, padded_B).

    Prefer large row tiles (per-step overhead ~0.35 us and MXU fill/drain
    amortize over more rows), keep >= 2 grid steps when B is large so the
    "parallel" axis can shard across v7x's two TensorCores, and handle
    non-divisible B by zero-padding the batch (padded rows are sliced off by
    the wrapper).  VMEM is never a constraint at these widths.
    """
    if B <= 256:
        return B, B                                   # single whole-batch block
    for cand in (2048, 1024, 512, 256, 128):          # exact divisor, >= 2 steps
        if 2 * cand <= B and B % cand == 0:
            return cand, B
    for cand in (512, 256, 128):                      # pad; waste bounded by < cand rows
        if 2 * cand <= B:
            return cand, int(pl.cdiv(B, cand)) * cand
    return B, B


def cross_attention(x1, x2, kp, *, out_dtype=None):
    """x1: [B, in_dim1], x2: [N2, in_dim2]; kp: packed params (see pack_params)."""
    B, in_dim1 = x1.shape
    out_dtype = out_dtype or x1.dtype

    # Tiny XLA precompute (not block_q-scaled): K/V projections and the
    # reassociated epilogue operand vo = V @ Wo.  These depend only on x2, so
    # computing them once here avoids redoing them on every grid step and drops
    # x2 / Wk / Wv / Wo / their biases from the kernel operand list.
    k2 = jnp.dot(x2, kp["wk"], preferred_element_type=jnp.float32) + kp["bk"]
    v2 = jnp.dot(x2, kp["wv"], preferred_element_type=jnp.float32) + kp["bv"]
    vo = jnp.dot(v2, kp["wo"], preferred_element_type=jnp.float32)
    k_bf = k2.astype(jnp.bfloat16)                    # [N2, k_dim]
    vo_bf = vo.astype(jnp.bfloat16)                   # [N2, in_dim1]

    block_q, padded_B = _grid_plan(B)
    x1_in = x1.astype(jnp.bfloat16)                   # halve the block_q-scaled input DMA
    if padded_B != B:
        x1_in = jnp.pad(x1_in, ((0, padded_B - B), (0, 0)))
    grid = (padded_B // block_q,)

    vmem = pl.BlockSpec(memory_space=pltpu.MemorySpace.VMEM)  # whole array, VMEM-resident
    out = pl.pallas_call(
        cross_attention_kernel,
        out_shape=jax.ShapeDtypeStruct((padded_B, in_dim1), out_dtype),
        grid=grid,
        in_specs=[
            pl.BlockSpec((block_q, in_dim1), lambda i: (i, 0)),   # x1: tiled over rows
            vmem, vmem,                                            # wq, bq
            vmem, vmem,                                            # k,  vo
            vmem,                                                  # bo
        ],
        out_specs=pl.BlockSpec((block_q, in_dim1), lambda i: (i, 0)),
        compiler_params=pltpu.CompilerParams(
            dimension_semantics=("parallel",)),
    )(x1_in, kp["wq"], kp["bq"], k_bf, vo_bf, kp["bo"])

    return out[:B] if padded_B != B else out


def init_params(key, in_dim1, in_dim2, k_dim, v_dim):
    """PyTorch nn.Linear default init, stored as (in, out) weights / (1, out) biases."""
    ks = jax.random.split(key, 8)

    def lin(kw, kb, fan_in, fan_out):
        bound = 1.0 / np.sqrt(fan_in)
        w = jax.random.uniform(kw, (fan_in, fan_out), jnp.float32, -bound, bound)
        b = jax.random.uniform(kb, (1, fan_out), jnp.float32, -bound, bound)
        return w, b

    wq, bq = lin(ks[0], ks[1], in_dim1, k_dim)
    wk, bk = lin(ks[2], ks[3], in_dim2, k_dim)
    wv, bv = lin(ks[4], ks[5], in_dim2, v_dim)
    wo, bo = lin(ks[6], ks[7], v_dim, in_dim1)
    return dict(wq=wq, bq=bq, wk=wk, bk=bk, wv=wv, bv=bv, wo=wo, bo=bo)


def pack_params(p):
    """Host-side packing: fold the 1/sqrt(8) scale into Wq/bq (matches the
    PyTorch literal `8 ** 0.5`) and pre-cast the only block_q-scaled matmul
    weight (Wq) to bf16.  Wk/Wv/Wo stay f32: they are consumed by the wrapper's
    tiny XLA precompute, not by the kernel."""
    scale = jnp.float32(1.0 / np.sqrt(8.0))
    return dict(
        wq=(p["wq"] * scale).astype(jnp.bfloat16),
        bq=(p["bq"] * scale).astype(jnp.float32),
        wk=p["wk"], bk=p["bk"],
        wv=p["wv"], bv=p["bv"],
        wo=p["wo"], bo=p["bo"].astype(jnp.float32))


def reference_f32(x1, x2, p):
    """Exact f32 semantics of the original PyTorch module."""
    q = x1 @ p["wq"] + p["bq"]
    k = x2 @ p["wk"] + p["bk"]
    v = x2 @ p["wv"] + p["bv"]
    attn = jax.nn.softmax((q @ k.T) / np.sqrt(8.0), axis=-1)
    return attn @ v @ p["wo"] + p["bo"]


def reference_matched(x1, x2, kp):
    """Pure-JAX replica of the kernel's bf16-operand / f32-accumulate math
    (exact softmax division instead of the EUP approx reciprocal)."""
    bf = jnp.bfloat16
    q = jnp.dot(x1.astype(bf), kp["wq"], preferred_element_type=jnp.float32) + kp["bq"]
    k2 = jnp.dot(x2, kp["wk"], preferred_element_type=jnp.float32) + kp["bk"]
    v2 = jnp.dot(x2, kp["wv"], preferred_element_type=jnp.float32) + kp["bv"]
    vo = jnp.dot(v2, kp["wo"], preferred_element_type=jnp.float32).astype(bf)
    logits = jax.lax.dot_general(q.astype(bf), k2.astype(bf),
                                 dimension_numbers=(((1,), (1,)), ((), ())),
                                 preferred_element_type=jnp.float32)
    attn = jax.nn.softmax(logits, axis=-1).astype(bf)
    return jnp.dot(attn, vo, preferred_element_type=jnp.float32) + kp["bo"]


if __name__ == "__main__":
    B, N2 = 8, 8
    in_dim1, in_dim2, k_dim, v_dim, num_heads = 32, 16, 32, 32, 4  # num_heads unused by forward

    key = jax.random.PRNGKey(0)
    kx1, kx2, kparam = jax.random.split(key, 3)
    x1 = jax.random.normal(kx1, (B, in_dim1), jnp.float32)
    x2 = jax.random.normal(kx2, (N2, in_dim2), jnp.float32)

    params = init_params(kparam, in_dim1, in_dim2, k_dim, v_dim)
    kp = pack_params(params)

    out = cross_attention(x1, x2, kp, out_dtype=jnp.float32)
    out = jax.block_until_ready(out)

    # Tight check vs a pure-JAX replica of the kernel's numerics.
    ref_bf16 = reference_matched(x1, x2, kp)
    np.testing.assert_allclose(np.asarray(out), np.asarray(ref_bf16),
                               rtol=5e-3, atol=5e-3)
    # Loose sanity check vs the exact f32 semantics of the original module.
    ref_f32 = reference_f32(x1, x2, params)
    np.testing.assert_allclose(np.asarray(out), np.asarray(ref_f32),
                               rtol=5e-2, atol=5e-2)
    print("KERNEL_OK")
</pallas_src>

<mosaic_0001>
module attributes {stable_mosaic.version = 11 : i64} {
  func.func @cross_attention_kernel(%arg0: i32, %arg1: memref<8x32xbf16, #tpu.memory_space<vmem>>, %arg2: memref<32x32xbf16, #tpu.memory_space<vmem>>, %arg3: memref<1x32xf32, #tpu.memory_space<vmem>>, %arg4: memref<8x32xbf16, #tpu.memory_space<vmem>>, %arg5: memref<8x32xbf16, #tpu.memory_space<vmem>>, %arg6: memref<1x32xf32, #tpu.memory_space<vmem>>, %arg7: memref<8x32xf32, #tpu.memory_space<vmem>>) attributes {dimension_semantics = [#tpu.dimension_semantics<parallel>], iteration_bounds = array<i64: 1>, scalar_prefetch = 0 : i64, scratch_operands = 0 : i64, tpu.core_type = #tpu.core_type<tc>, window_params = [{transform_indices = @transform_0, window_bounds = array<i64: 8, 32>}, {pipeline_mode = #tpu.pipeline_mode<synchronous>, transform_indices = @transform_1, window_bounds = array<i64: 32, 32>}, {pipeline_mode = #tpu.pipeline_mode<synchronous>, transform_indices = @transform_2, window_bounds = array<i64: 1, 32>}, {pipeline_mode = #tpu.pipeline_mode<synchronous>, transform_indices = @transform_3, window_bounds = array<i64: 8, 32>}, {pipeline_mode = #tpu.pipeline_mode<synchronous>, transform_indices = @transform_4, window_bounds = array<i64: 8, 32>}, {pipeline_mode = #tpu.pipeline_mode<synchronous>, transform_indices = @transform_5, window_bounds = array<i64: 1, 32>}, {transform_indices = @transform_6, window_bounds = array<i64: 8, 32>}]} {
    %c0 = arith.constant 0 : index
    %c0_0 = arith.constant 0 : index
    %0 = vector.load %arg1[%c0, %c0_0] : memref<8x32xbf16, #tpu.memory_space<vmem>>, vector<8x32xbf16>
    %c0_1 = arith.constant 0 : index
    %c0_2 = arith.constant 0 : index
    %1 = vector.load %arg2[%c0_1, %c0_2] : memref<32x32xbf16, #tpu.memory_space<vmem>>, vector<32x32xbf16>
    %cst = arith.constant dense<0.000000e+00> : vector<8x32xf32>
    %2 = tpu.matmul %0, %1, %cst {dimension_numbers = #tpu.dot_dimension_numbers<[1], [0], [0], [1], [0, 0, 1, 1], [], []>} : vector<8x32xbf16>, vector<32x32xbf16>, vector<8x32xf32> -> vector<8x32xf32>
    %c0_3 = arith.constant 0 : index
    %c0_4 = arith.constant 0 : index
    %3 = vector.load %arg3[%c0_3, %c0_4] : memref<1x32xf32, #tpu.memory_space<vmem>>, vector<1x32xf32>
    %4 = vector.broadcast %3 : vector<1x32xf32> to vector<8x32xf32>
    %5 = arith.addf %2, %4 : vector<8x32xf32>
    %6 = arith.truncf %5 : vector<8x32xf32> to vector<8x32xbf16>
    %c0_5 = arith.constant 0 : index
    %c0_6 = arith.constant 0 : index
    %7 = vector.load %arg4[%c0_5, %c0_6] : memref<8x32xbf16, #tpu.memory_space<vmem>>, vector<8x32xbf16>
    %cst_7 = arith.constant dense<0.000000e+00> : vector<8x8xf32>
    %8 = tpu.matmul %6, %7, %cst_7 {dimension_numbers = #tpu.dot_dimension_numbers<[1], [1], [0], [0], [0, 0, 1, 0], [], []>} : vector<8x32xbf16>, vector<8x32xbf16>, vector<8x8xf32> -> vector<8x8xf32>
    %cst_8 = arith.constant dense<0xFF800000> : vector<8xf32>
    %9 = vector.multi_reduction <maximumf>, %8, %cst_8 [1] : vector<8x8xf32> to vector<8xf32>
    %10 = vector.shape_cast %9 : vector<8xf32> to vector<8x1xf32>
    %11 = vector.broadcast %10 : vector<8x1xf32> to vector<8x8xf32>
    %12 = arith.subf %8, %11 : vector<8x8xf32>
    %13 = math.exp %12 : vector<8x8xf32>
    %cst_9 = arith.constant dense<0.000000e+00> : vector<8xf32>
    %14 = vector.multi_reduction <add>, %13, %cst_9 [1] : vector<8x8xf32> to vector<8xf32>
    %15 = vector.shape_cast %14 : vector<8xf32> to vector<8x1xf32>
    %16 = tpu.reciprocal %15 {approx = true} : vector<8x1xf32> -> vector<8x1xf32>
    %17 = vector.broadcast %16 : vector<8x1xf32> to vector<8x8xf32>
    %18 = arith.mulf %13, %17 : vector<8x8xf32>
    %19 = arith.truncf %18 : vector<8x8xf32> to vector<8x8xbf16>
    %c0_10 = arith.constant 0 : index
    %c0_11 = arith.constant 0 : index
    %20 = vector.load %arg5[%c0_10, %c0_11] : memref<8x32xbf16, #tpu.memory_space<vmem>>, vector<8x32xbf16>
    %cst_12 = arith.constant dense<0.000000e+00> : vector<8x32xf32>
    %21 = tpu.matmul %19, %20, %cst_12 {dimension_numbers = #tpu.dot_dimension_numbers<[1], [0], [0], [1], [0, 0, 1, 1], [], []>} : vector<8x8xbf16>, vector<8x32xbf16>, vector<8x32xf32> -> vector<8x32xf32>
    %c0_13 = arith.constant 0 : index
    %c0_14 = arith.constant 0 : index
    %22 = vector.load %arg6[%c0_13, %c0_14] : memref<1x32xf32, #tpu.memory_space<vmem>>, vector<1x32xf32>
    %23 = vector.broadcast %22 : vector<1x32xf32> to vector<8x32xf32>
    %24 = arith.addf %21, %23 : vector<8x32xf32>
    %c0_15 = arith.constant 0 : index
    %c0_16 = arith.constant 0 : index
    %25 = vector.load %arg7[%c0_15, %c0_16] : memref<8x32xf32, #tpu.memory_space<vmem>>, vector<8x32xf32>
    tpu.vector_store %arg7[%c0_15, %c0_16], %24 {strides = array<i32>} : memref<8x32xf32, #tpu.memory_space<vmem>>, vector<8x32xf32>,
    return
  }
  func.func @transform_0(%arg0: i32) -> (i32, i32) {
    %c0_i32 = arith.constant 0 : i32
    %c0_i32_0 = arith.constant 0 : i32
    return %arg0, %c0_i32 : i32, i32
  }
  func.func @transform_1(%arg0: i32) -> (i32, i32) {
    %c0_i32 = arith.constant 0 : i32
    %c0_i32_0 = arith.constant 0 : i32
    %c0_i32_1 = arith.constant 0 : i32
    return %c0_i32, %c0_i32_0 : i32, i32
  }
  func.func @transform_2(%arg0: i32) -> (i32, i32) {
    %c0_i32 = arith.constant 0 : i32
    %c0_i32_0 = arith.constant 0 : i32
    %c0_i32_1 = arith.constant 0 : i32
    return %c0_i32, %c0_i32_0 : i32, i32
  }
  func.func @transform_3(%arg0: i32) -> (i32, i32) {
    %c0_i32 = arith.constant 0 : i32
    %c0_i32_0 = arith.constant 0 : i32
    %c0_i32_1 = arith.constant 0 : i32
    return %c0_i32, %c0_i32_0 : i32, i32
  }
  func.func @transform_4(%arg0: i32) -> (i32, i32) {
    %c0_i32 = arith.constant 0 : i32
    %c0_i32_0 = arith.constant 0 : i32
    %c0_i32_1 = arith.constant 0 : i32
    return %c0_i32, %c0_i32_0 : i32, i32
  }
  func.func @transform_5(%arg0: i32) -> (i32, i32) {
    %c0_i32 = arith.constant 0 : i32
    %c0_i32_0 = arith.constant 0 : i32
    %c0_i32_1 = arith.constant 0 : i32
    return %c0_i32, %c0_i32_0 : i32, i32
  }
  func.func @transform_6(%arg0: i32) -> (i32, i32) {
    %c0_i32 = arith.constant 0 : i32
    %c0_i32_0 = arith.constant 0 : i32
    return %arg0, %c0_i32 : i32, i32
  }
}

</mosaic_0001>

<bundles_post_ra>
// kernel: tpu_custom_call.1
= control target key start
LH: loop header
LB: loop body
LE: loop exit
PB: predicated region body
PF: predicated region fallthrough
CT: control target
= control target key end

     0   :  { %11 = vsyncpa [#allocation3], 0  ;;  %s478_s0 = inlined_call_operand.hbm [shape: bf16[8,32], index: 0, kind: input, shape index: {}]   ;;  %s479_s1 = inlined_call_operand.hbm [shape: bf16[32,32], index: 1, kind: input, shape index: {}]   ;;  %s480_s2 = inlined_call_operand.vmem [shape: f32[1,32], index: 2, kind: input, shape index: {}]   ;;  %s481_s3 = inlined_call_operand.vmem [shape: bf16[8,32], index: 3, kind: input, shape index: {}]   ;;  %s482_s4 = inlined_call_operand.vmem [shape: bf16[8,32], index: 4, kind: input, shape index: {}]   ;;  %s483_s5 = inlined_call_operand.vmem [shape: f32[1,32], index: 5, kind: input, shape index: {}]   ;;  %s484_s6 = inlined_call_operand.hbm [shape: f32[8,32], index: 6, kind: output, shape index: {}]  }
   0x1   :  { %12 = vsyncpa [#allocation6], 0 }
   0x2   :  { %13 = vsyncpa [#allocation4], 0  ;;  %s371_s21 = smov [#allocation2]   ;;  %s372_s23 = smov [#allocation5]  }
   0x3   :  { %s20_s22 = sshll.u32 %s371_s21, 4  ;;  %s29_s24 = sshll.u32 %s372_s23, 4  ;;  %s21_s22 = int_to_ptr.vmem [resolvable:$true] %s20_s22  ;;  %s413_s24 = int_to_ptr.vmem [resolvable:$true] %s29_s24 }
   0x4   :  { %s299_s27 = scalar_lea.hbm %s478_s0, 64 }
   0x5   :  { %p300_p0 = scmp.ne.s32.totalorder %s478_s0, %s299_s27  ;;  %p303_p1 = scmp.lt.u32.totalorder %s299_s27, %s478_s0 }
   0x7   :  { %p305_p2 = pnand %p303_p1, %p300_p0 }
   0x9   :  { %308 = shalt.err (!%p305_p2)
}
   0xa   :  { %s309_s8 = scalar_lea.vmem %s21_s22, 64  ;;  %p314_p4 = scmp.lt.s32.totalorder %s21_s22, %s21_s22 }
   0xb   :  { %p310_p3 = scmp.ne.s32.totalorder %s21_s22, %s309_s8  ;;  %p315_p5 = scmp.lt.s32.totalorder %s309_s8, %s309_s8 }
   0xd   :  { %p316_p6 = por %p315_p5, %p314_p4 }
   0xf   :  { %p317_p7 = pnand %p316_p6, %p310_p3 }
  0x11   :  { %320 = shalt.err (!%p317_p7)
}
  0x12   :  { %23 = dma.hbm_to_vmem [thread:$0]  %s478_s0, 64, %s21_s22, [#allocation3]  }
  0x13   :  { %s321_s13 = scalar_lea.hbm %s479_s1, 256 }
  0x14   :  { %p322_p8 = scmp.ne.s32.totalorder %s479_s1, %s321_s13  ;;  %p325_p9 = scmp.lt.u32.totalorder %s321_s13, %s479_s1 }
  0x16   :  { %p327_p10 = pnand %p325_p9, %p322_p8 }
  0x18   :  { %330 = shalt.err (!%p327_p10)
}
  0x19   :  { %s331_s18 = scalar_lea.vmem %s413_s24, 256  ;;  %p336_p12 = scmp.lt.s32.totalorder %s413_s24, %s413_s24 }
  0x1a   :  { %p332_p11 = scmp.ne.s32.totalorder %s413_s24, %s331_s18  ;;  %p337_p13 = scmp.lt.s32.totalorder %s331_s18, %s331_s18 }
  0x1c   :  { %p338_p0 = por %p337_p13, %p336_p12 }
  0x1e   :  { %p339_p1 = pnand %p338_p0, %p332_p11 }
  0x20   :  { %342 = shalt.err (!%p339_p1)
}
  0x21   :  { %s373_s0 = smov 64   ;;  %s374_s19 = smov 4  }
  0x22   :  { %35 = dma.hbm_to_vmem [thread:$0]  %s479_s1, 256, %s413_s24, [#allocation6], %s373_s0, %s373_s0, %s374_s19  }
  0x23   :  { %365 = dma.done.wait [#allocation3], 64  }
  0x24   :  { %366 = vsyncadd [#allocation3], 4294967232 }
  0x25   :  { %367 = dma.done.wait [#allocation6], 256  }
  0x26   :  { %368 = vsyncadd [#allocation6], 4294967040  ;;  %v375_v0 = vmov 0.0   ;;  %vm376_vm0 = vmmov 0   ;;  %v293_v1 = vld [vmem:[#allocation5] sm:$0xff]   ;;  %v294_v2 = vld [vmem:[#allocation5 + $0x8] sm:$0xff]  }
  0x27   :  { %266 = vmatprep.subr.bf16.mxu0 %v375_v0  ;;  %270 = vmatprep.mubr.msk.bf16.mxu0 %vm376_vm0, %v375_v0  ;;  %vm75_vm1 = vcmask 261120   ;;  %v120_v3 = vld [vmem:[%s481_s3] sm:$0xf]  ;;  %vm167_vm2 = vcmask 64512   ;;  %vm191_vm3 = vcmask 1043456   ;;  %s377_s27 = smov [#allocation7]  }
  0x28   :  { %274 = vmatprep.subr.bf16.mxu1 %v375_v0  ;;  %276 = vmatprep.mubr.msk.bf16.mxu1 %vm376_vm0, %v375_v0  ;;  %v125_v4 = vsel %vm75_vm1, %v120_v3, 0  ;;  %v51_v5 = vld [vmem:[#allocation2] sm:$0xf]  ;;  %s242_s28 = sshll.u32 %s377_s27, 4  ;;  %s243_s28 = int_to_ptr.vmem [resolvable:$true] %s242_s28 }
  0x29   :  { %267 = vmatpush3.bf16.msra.mxu0 %v293_v1  ;;  %275 = vmatpush3.bf16.xpose.msra.mxu1 %v125_v4  ;;  %v252_v6 = vld [vmem:[%s480_s2] ss:$0 sm:$0xff]  ;;  %p348_p3 = scmp.lt.s32.totalorder %s243_s28, %s243_s28 }
  0x2a   :  { %268 = vmatprep.subr.bf16.mxu0 %v375_v0  ;;  %v180_v23 = vld [vmem:[%s482_s4] sm:$0xf]  ;;  %s343_s4 = scalar_lea.vmem %s243_s28, 128 }
  0x2b   :  { %v193_v24 = vsel %vm191_vm3, %v180_v23, 0  ;;  %v257_v29 = vld [vmem:[%s483_s5] ss:$0 sm:$0xff]  ;;  %p344_p2 = scmp.ne.s32.totalorder %s243_s28, %s343_s4  ;;  %p349_p4 = scmp.lt.s32.totalorder %s343_s4, %s343_s4 }
  0x2d   :  { %269 = vmatpush3.bf16.msra.mxu0 %v294_v2  ;;  %p350_p5 = por %p349_p4, %p348_p3 }
  0x2e   :  { %280 = vmatprep.subr.bf16.mxu0 %v375_v0 }
  0x2f   :  { %p351_p6 = pnand %p350_p5, %p344_p2 }
  0x30   :  { %271 = vmatmul.mubr.msk.bf16.vlgmr.msra.gmra.mrb[0].mxu0 %vm75_vm1, %v51_v5 }
  0x31   :  { %282 = vmatprep.mubr.msk.bf16.mxu0 %vm376_vm0, %v375_v0  ;;  %281 = vmatpush3.bf16.msra.mxu0 %v193_v24 }
 0x103   :  { %v113_v7 = vpop.f32.mrb[0].mxu0 }
 0x104   :  { %v114_v8 = vadd.f32 %v252_v6, %v113_v7  ;;  %v272_v9 = vpop.f32.mrb[1].mxu0 }
 0x105   :  { %v116_v10 = vpop.f32.mrb[2].mxu0 }
 0x106   :  { %v119_v11 = vpack.c.bf16 %v114_v8, %v114_v8  ;;  %v273_v12 = vpop.f32.mrb[3].mxu0 }
 0x108   :  { %277 = vmatmul.mubr.msk.bf16.vlgmr.msra.gmra.mrb[0].mxu1 %vm75_vm1, %v119_v11 }
 0x1db   :  { %v161_v13 = vpop.f32.mrb[0].mxu1 }
 0x1dc   :  { %v278_v14 = vpop.f32.mrb[1].mxu1  ;;  %v168_v15 = vsel %vm167_vm2, %v161_v13, -inf }
 0x1dd   :  { %169 = vmax.xlane.f32.xlu0 %v168_v15  ;;  %v164_v16 = vpop.f32.mrb[2].mxu1 }
 0x1de   :  { %v279_v17 = vpop.f32.mrb[3].mxu1 }
 0x26a   :  { %v170_v18 = vpop.xlane.xlu0 %169 }
 0x26b   :  { %v171_v19 = vsub.f32 %v161_v13, %v170_v18 }
 0x26d   :  { %v172_v20 = vmul.f32 1.442695, %v171_v19 }
 0x26f   :  { %295 = vpow2.f32 %v172_v20 }
 0x279   :  { %v296_v21 = vpop.eup %295 }
 0x27a   :  { %v174_v22 = vsel %vm167_vm2, %v296_v21, 0.0 }
 0x27b   :  { %175 = vadd.xlane.f32.xlu0 %v174_v22 }
 0x308   :  { %v176_v25 = vpop.xlane.xlu0 %175 }
 0x309   :  { %297 = vrcp.f32 %v176_v25 }
 0x313   :  { %v298_v26 = vpop.eup %297 }
 0x314   :  { %v178_v27 = vmul.f32 %v298_v26, %v296_v21 }
 0x316   :  { %v179_v28 = vpack.c.bf16 %v178_v27, %v178_v27 }
 0x318   :  { %283 = vmatmul.mubr.msk.bf16.vlgmr.msra.gmra.mrb[4].mxu0 %vm167_vm2, %v179_v28 }
 0x3eb   :  { %v229_v30 = vpop.f32.mrb[4].mxu0 }
 0x3ec   :  { %v230_v31 = vadd.f32 %v257_v29, %v229_v30  ;;  %v284_v32 = vpop.f32.mrb[5].mxu0 }
 0x3ed   :  { %v232_v33 = vpop.f32.mrb[6].mxu0 }
 0x3ee   :  { %235 = vst.msk [vmem:[#allocation7] sm:$0xff] %vm75_vm1, %v230_v31  ;;  %v285_v34 = vpop.f32.mrb[7].mxu0 }
 0x3ef   :  { %354 = shalt.err (!%p351_p6)
}
 0x3f0   :  { %s355_s5 = scalar_lea.hbm %s484_s6, 128 }
 0x3f1   :  { %p356_p7 = scmp.ne.s32.totalorder %s484_s6, %s355_s5  ;;  %p359_p8 = scmp.lt.u32.totalorder %s355_s5, %s484_s6 }
 0x3f3   :  { %p361_p9 = pnand %p359_p8, %p356_p7 }
 0x3f5   :  { %364 = shalt.err (!%p361_p9)
}
 0x3f6   :  { %245 = dma.vmem_to_hbm [thread:$0]  %s243_s28, 128, %s484_s6, [#allocation4]  }
 0x3f7   :  { %369 = dma.done.wait [#allocation4], 128  }
 0x3f8   :  { %370 = vsyncadd [#allocation4], 4294967168 }
 0x3f9   :  { %249 = vsyncpa [#allocation3], 1 }
 0x3fa   :  { %250 = vsyncpa [#allocation6], 1 }
 0x3fb   :  { %251 = vsyncpa [#allocation4], 1 }

</bundles_post_ra>
